<compile_context>
chip_gen: v7x
topology: tpu7x:2x2x1
jax: 0.10.0
libtpu: 0.0.40
codegen_flags: <defaults>
</compile_context>

<pallas_src>
import jax
import jax.numpy as jnp
import numpy as np
from jax.experimental import pallas as pl
from jax.experimental.pallas import tpu as pltpu


def fed_model_kernel(itemT_ref, simT_ref, wsimT_ref, aux_ref, out_ref):
    """One batch tile of the fused forward pass (batch on lanes).

    itemT_ref : (H, TB)  f32   gathered (item_emb @ w1_item + const) rows, transposed
    simT_ref  : (N, TB)  bf16  similarity features for this tile, transposed
    wsimT_ref : (H, N)   bf16  (wsim @ w1_sim)ᵀ, VMEM-resident across grid
    aux_ref   : (H, 2)   f32   col 0 = fc2 weight column, aux[0,1] = fc2 bias
    out_ref   : (1, TB)  f32   sigmoid(logits), lane-dense
    """
    # fc1 (sim path) on the MXU: (H, N) @ (N, TB) -> (H, TB), f32 accumulation.
    h1t = jnp.dot(wsimT_ref[...], simT_ref[...],
                  preferred_element_type=jnp.float32)
    # Item + user + bias contributions were folded into the gathered rows.
    h1t = h1t + itemT_ref[...]
    h1t = jnp.maximum(h1t, 0.0)                      # ReLU (VPU)

    # fc2: elementwise scale by w2 column + sublane reduce — no transpose needed.
    w2_col = aux_ref[:, 0:1]                         # (H, 1)
    b2 = aux_ref[0:1, 1:2]                           # (1, 1)
    logits = jnp.sum(h1t * w2_col, axis=0, keepdims=True) + b2   # (1, TB)
    out_ref[...] = jax.nn.sigmoid(logits)            # f32 epilogue (EUP)


def prepare_fused_params(params, compute_dtype=jnp.bfloat16):
    """One-time algebraic fusion (exact in f32) + dtype casts for the kernel."""
    H = params["user_embedding"].shape[1]
    w1 = params["w1"]                                # (3H, H), stored transposed
    w1_user, w1_item, w1_sim = w1[:H], w1[H:2 * H], w1[2 * H:]

    # Constant row shared by every batch element.
    const_row = (params["user_embedding"] @ w1_user
                 + params["bsim"] @ w1_sim
                 + params["b1"])                                       # (1, H)
    # Fold item table AND the constant row through fc1 (no nonlinearity between).
    item_fc1_table = params["item_embedding"] @ w1_item + const_row    # (N, H) f32
    # Fold similarity layer weight through fc1, store transposed for (H,TB) output.
    w_sim_fused_T = (params["wsim"] @ w1_sim).T.astype(compute_dtype)  # (H, N)

    aux = jnp.zeros((H, 2), jnp.float32)
    aux = aux.at[:, 0].set(params["w2"][:, 0])       # fc2 weight column
    aux = aux.at[0, 1].set(params["b2"][0, 0])       # fc2 bias scalar

    return {
        "item_fc1_table_T": item_fc1_table.T.astype(jnp.float32),  # (H, N)
        "w_sim_fused_T": w_sim_fused_T,                            # (H, N) bf16
        "aux": aux,                                                # (H, 2) f32
    }


def _choose_tile(batch, *, tb_max=2048, min_tiles=2):
    """Large lane-aligned batch tile, but keep >= min_tiles grid steps so the
    parallel grid axis can shard across both TensorCores on v7x."""
    target = pl.cdiv(batch, min_tiles)
    tb = ((target + 127) // 128) * 128
    return max(128, min(tb_max, tb))


def fed_model_forward(fused, user_id, item_id, h, sim, *, tb=None):
    """Pallas-backed forward. user_id and h are accepted for signature parity
    but unused (matching the PyTorch forward with temporal=False)."""
    del user_id, h

    tbl_T = fused["item_fc1_table_T"]                # (H, N) f32
    wsimT = fused["w_sim_fused_T"]                   # (H, N) bf16
    aux = fused["aux"]                               # (H, 2) f32
    H, N = wsimT.shape

    B = item_id.shape[0]
    if tb is None:
        tb = _choose_tile(B)
    num_tiles = pl.cdiv(B, tb)
    b_pad = num_tiles * tb

    # Wrapper-side glue: fused-table gather + transposes to batch-on-lanes layout.
    itemT = jnp.take(tbl_T, item_id, axis=1)         # (H, B) f32
    simT = sim.T.astype(wsimT.dtype)                 # (N, B) bf16

    if b_pad != B:
        pad = b_pad - B
        itemT = jnp.pad(itemT, ((0, 0), (0, pad)))
        simT = jnp.pad(simT, ((0, 0), (0, pad)))

    grid_spec = pltpu.PrefetchScalarGridSpec(
        num_scalar_prefetch=0,
        grid=(num_tiles,),
        in_specs=[
            pl.BlockSpec((H, tb), lambda i: (0, i)),   # gathered item/fc1 tile
            pl.BlockSpec((N, tb), lambda i: (0, i)),   # simᵀ tile
            pl.BlockSpec((H, N), lambda i: (0, 0)),    # fused sim weight (resident)
            pl.BlockSpec((H, 2), lambda i: (0, 0)),    # fc2 weight col + bias (resident)
        ],
        out_specs=pl.BlockSpec((1, tb), lambda i: (0, i)),   # lane-dense row slab
    )

    out = pl.pallas_call(
        fed_model_kernel,
        out_shape=jax.ShapeDtypeStruct((1, b_pad), jnp.float32),
        grid_spec=grid_spec,
        compiler_params=pltpu.CompilerParams(
            dimension_semantics=("parallel",)),
    )(itemT, simT, wsimT, aux)

    return out[0, :B]                                # (B,)


def fed_model_reference(params, item_id, sim):
    """Pure-JAX f32 reference mirroring the PyTorch forward (temporal=False)."""
    ue = params["user_embedding"]
    ie = jnp.take(params["item_embedding"], item_id, axis=0)
    user_emb = jnp.broadcast_to(ue, (ie.shape[0], ue.shape[1]))
    sim_emb = sim @ params["wsim"] + params["bsim"]
    x = jnp.concatenate([user_emb, ie, sim_emb], axis=1)
    h1 = jnp.maximum(x @ params["w1"] + params["b1"], 0.0)
    logits = h1 @ params["w2"] + params["b2"]
    return jax.nn.sigmoid(logits).squeeze(-1)


def init_params(key, hidden_dim, num_items):
    ks = jax.random.split(key, 8)
    H, N = hidden_dim, num_items
    scale = 0.1
    return {
        # nn.Parameter(torch.randn(1, hidden_dim))
        "user_embedding": jax.random.normal(ks[0], (1, H), jnp.float32),
        # nn.Embedding(num_items, hidden_dim)
        "item_embedding": jax.random.normal(ks[1], (N, H), jnp.float32),
        # similarity_embedding = nn.Linear(num_items, hidden_dim); stored transposed
        "wsim": scale * jax.random.normal(ks[2], (N, H), jnp.float32),
        "bsim": scale * jax.random.normal(ks[3], (1, H), jnp.float32),
        # fc1 = nn.Linear(hidden_dim * 3, hidden_dim); stored transposed
        "w1": scale * jax.random.normal(ks[4], (3 * H, H), jnp.float32),
        "b1": scale * jax.random.normal(ks[5], (1, H), jnp.float32),
        # fc2 = nn.Linear(hidden_dim, 1); stored transposed
        "w2": scale * jax.random.normal(ks[6], (H, 1), jnp.float32),
        "b2": scale * jax.random.normal(ks[7], (1, 1), jnp.float32),
    }


if __name__ == "__main__":
    hidden_dim = 32
    num_items = 64
    feature_dim = 8
    batch = 500          # not a multiple of the tile -> exercises padding path
    seq = 4

    key = jax.random.PRNGKey(0)
    k_params, k_items, k_sim, k_h = jax.random.split(key, 4)

    params = init_params(k_params, hidden_dim, num_items)
    fused = prepare_fused_params(params)

    user_id = jnp.zeros((batch,), jnp.int32)                            # unused
    item_id = jax.random.randint(k_items, (batch,), 0, num_items)       # (B,)
    h = jax.random.normal(k_h, (batch, seq, feature_dim), jnp.float32)  # unused (temporal=False)
    sim = jax.random.normal(k_sim, (batch, num_items), jnp.float32)     # (B, num_items)

    out = fed_model_forward(fused, user_id, item_id, h, sim)  # auto tile: 256, 2 steps
    out = jax.block_until_ready(out)

    ref = fed_model_reference(params, item_id, sim)
    np.testing.assert_allclose(np.asarray(out), np.asarray(ref),
                               rtol=2e-2, atol=2e-2)   # bf16 MXU sim path, f32 acc
    assert out.shape == (batch,)

    print("KERNEL_OK")
</pallas_src>

<mosaic_0001>
module attributes {stable_mosaic.version = 11 : i64} {
  func.func @fed_model_kernel(%arg0: i32, %arg1: memref<32x256xf32, #tpu.memory_space<vmem>>, %arg2: memref<64x256xbf16, #tpu.memory_space<vmem>>, %arg3: memref<32x64xbf16, #tpu.memory_space<vmem>>, %arg4: memref<32x2xf32, #tpu.memory_space<vmem>>, %arg5: memref<1x256xf32, #tpu.memory_space<vmem>>) attributes {dimension_semantics = [#tpu.dimension_semantics<parallel>], iteration_bounds = array<i64: 2>, scalar_prefetch = 0 : i64, scratch_operands = 0 : i64, tpu.core_type = #tpu.core_type<tc>, window_params = [{transform_indices = @transform_0, window_bounds = array<i64: 32, 256>}, {transform_indices = @transform_1, window_bounds = array<i64: 64, 256>}, {pipeline_mode = #tpu.pipeline_mode<synchronous>, transform_indices = @transform_2, window_bounds = array<i64: 32, 64>}, {pipeline_mode = #tpu.pipeline_mode<synchronous>, transform_indices = @transform_3, window_bounds = array<i64: 32, 2>}, {transform_indices = @transform_4, window_bounds = array<i64: 1, 256>}]} {
    %c0 = arith.constant 0 : index
    %c0_0 = arith.constant 0 : index
    %0 = vector.load %arg3[%c0, %c0_0] : memref<32x64xbf16, #tpu.memory_space<vmem>>, vector<32x64xbf16>
    %c0_1 = arith.constant 0 : index
    %c0_2 = arith.constant 0 : index
    %1 = vector.load %arg2[%c0_1, %c0_2] : memref<64x256xbf16, #tpu.memory_space<vmem>>, vector<64x256xbf16>
    %cst = arith.constant dense<0.000000e+00> : vector<32x256xf32>
    %2 = tpu.matmul %0, %1, %cst {dimension_numbers = #tpu.dot_dimension_numbers<[1], [0], [0], [1], [0, 0, 1, 1], [], []>} : vector<32x64xbf16>, vector<64x256xbf16>, vector<32x256xf32> -> vector<32x256xf32>
    %c0_3 = arith.constant 0 : index
    %c0_4 = arith.constant 0 : index
    %3 = vector.load %arg1[%c0_3, %c0_4] : memref<32x256xf32, #tpu.memory_space<vmem>>, vector<32x256xf32>
    %4 = arith.addf %2, %3 : vector<32x256xf32>
    %cst_5 = arith.constant 0.000000e+00 : f32
    %5 = vector.broadcast %cst_5 : f32 to vector<32x256xf32>
    %6 = arith.maximumf %4, %5 : vector<32x256xf32>
    %c0_6 = arith.constant 0 : index
    %c0_7 = arith.constant 0 : index
    %7 = vector.load %arg4[%c0_6, %c0_7] : memref<32x2xf32, #tpu.memory_space<vmem>>, vector<32x1xf32>
    %c0_8 = arith.constant 0 : index
    %c1 = arith.constant 1 : index
    %8 = vector.load %arg4[%c0_8, %c1] : memref<32x2xf32, #tpu.memory_space<vmem>>, vector<1x1xf32>
    %9 = vector.broadcast %7 : vector<32x1xf32> to vector<32x256xf32>
    %10 = arith.mulf %6, %9 : vector<32x256xf32>
    %cst_9 = arith.constant dense<0.000000e+00> : vector<256xf32>
    %11 = vector.multi_reduction <add>, %10, %cst_9 [0] : vector<32x256xf32> to vector<256xf32>
    %12 = vector.shape_cast %11 : vector<256xf32> to vector<1x256xf32>
    %13 = vector.broadcast %8 : vector<1x1xf32> to vector<1x256xf32>
    %14 = arith.addf %12, %13 : vector<1x256xf32>
    %15 = arith.negf %14 : vector<1x256xf32>
    %16 = math.exp %15 : vector<1x256xf32>
    %cst_10 = arith.constant 1.000000e+00 : f32
    %17 = vector.broadcast %cst_10 : f32 to vector<1x256xf32>
    %18 = arith.addf %17, %16 : vector<1x256xf32>
    %19 = arith.divf %17, %18 : vector<1x256xf32>
    %c0_11 = arith.constant 0 : index
    %c0_12 = arith.constant 0 : index
    %20 = vector.load %arg5[%c0_11, %c0_12] : memref<1x256xf32, #tpu.memory_space<vmem>>, vector<1x256xf32>
    tpu.vector_store %arg5[%c0_11, %c0_12], %19 {strides = array<i32>} : memref<1x256xf32, #tpu.memory_space<vmem>>, vector<1x256xf32>,
    return
  }
  func.func @transform_0(%arg0: i32) -> (i32, i32) {
    %c0_i32 = arith.constant 0 : i32
    %c0_i32_0 = arith.constant 0 : i32
    return %c0_i32, %arg0 : i32, i32
  }
  func.func @transform_1(%arg0: i32) -> (i32, i32) {
    %c0_i32 = arith.constant 0 : i32
    %c0_i32_0 = arith.constant 0 : i32
    return %c0_i32, %arg0 : i32, i32
  }
  func.func @transform_2(%arg0: i32) -> (i32, i32) {
    %c0_i32 = arith.constant 0 : i32
    %c0_i32_0 = arith.constant 0 : i32
    %c0_i32_1 = arith.constant 0 : i32
    return %c0_i32, %c0_i32_0 : i32, i32
  }
  func.func @transform_3(%arg0: i32) -> (i32, i32) {
    %c0_i32 = arith.constant 0 : i32
    %c0_i32_0 = arith.constant 0 : i32
    %c0_i32_1 = arith.constant 0 : i32
    return %c0_i32, %c0_i32_0 : i32, i32
  }
  func.func @transform_4(%arg0: i32) -> (i32, i32) {
    %c0_i32 = arith.constant 0 : i32
    %c0_i32_0 = arith.constant 0 : i32
    return %c0_i32, %arg0 : i32, i32
  }
}

</mosaic_0001>

<bundles_post_ra>
// kernel: tpu_custom_call.1
= control target key start
LH: loop header
LB: loop body
LE: loop exit
PB: predicated region body
PF: predicated region fallthrough
CT: control target
= control target key end

     0   :  { %9 = vsyncpa [#allocation3], 0  ;;  %s1152_s0 = inlined_call_operand.hbm [shape: f32[32,512], index: 0, kind: input, shape index: {}]   ;;  %s1153_s1 = inlined_call_operand.hbm [shape: bf16[64,512], index: 1, kind: input, shape index: {}]   ;;  %s1154_s2 = inlined_call_operand.vmem [shape: bf16[32,64], index: 2, kind: input, shape index: {}]   ;;  %s1155_s3 = inlined_call_operand.vmem [shape: f32[32,2], index: 3, kind: input, shape index: {}]   ;;  %s1156_s4 = inlined_call_operand.hbm [shape: f32[1,512], index: 4, kind: output, shape index: {}]  }
   0x1   :  { %11 = vsyncpa [#allocation3 + $0x1], 0 }
   0x2   :  { %12 = vsyncpa [#allocation6], 0 }
   0x3   :  { %14 = vsyncpa [#allocation6 + $0x1], 0 }
   0x4   :  { %15 = vsyncpa [#allocation4], 0 }
   0x5   :  { %17 = vsyncpa [#allocation4 + $0x1], 0  ;;  %s894_s15 = smov 0   ;;  %s896_s16 = smov 0  }
   0x6   :  { %s898_s17 = smov 0   ;;  %s900_s18 = smov 0  }
   0x7 LB: > { %s915_s19 = sadd.s32 4294967295, %s856_s18   ;;  %s599_s20 = sadd.s32 4294967294, %s856_s18   ;;  %s856_s18 = sphi %s900_s18, %s1173_s18   ;;  %s852_s17 = sphi %s898_s17, %s1172_s17   ;;  %s848_s16 = sphi %s896_s16, %s1171_s16   ;;  %s844_s15 = sphi %s894_s15, %s1170_s15  }
   0x8   : > { %s919_s21 = sadd.s32 1, %s856_s18   ;;  %s30_s22 = sadd.s32 1, %s852_s17 }
   0x9   : > { %s27_s23 = ssub.s32 %s856_s18, %s919_s21  ;;  %p37_p0 = scmp.ne.s32.totalorder %s852_s17, %s848_s16 }
   0xa   : > { %p28_p1 = scmp.eq.s32.totalorder %s27_s23, 0  ;;  %p38_p2 = scmp.eq.s32.totalorder %s856_s18, 0 }
   0xb   : > { %p43_p3 = scmp.ne.s32.totalorder %s848_s16, %s844_s15  ;;  %p44_p4 = scmp.eq.s32.totalorder %s915_s19, 0 }
   0xc   : > { %s931_s24 = scalar_select %p28_p1, %s852_s17, %s30_s22  }
   0xd   : > { %p933_p5 = por %p38_p2, %p37_p0  ;;  %p937_p6 = por %p44_p4, %p43_p3 }
   0xe   : > { %p135_p7 = scmp.eq.s32.totalorder %s915_s19, 1  ;;  %p141_p8 = scmp.eq.s32.totalorder %s599_s20, 1 }
   0xf   : > { %s1160_s26 = scalar_select %p937_p6, 1, 0 }
  0x10   : > { %p659_p10 = scmp.lt.s32.totalorder %s856_s18, 2  ;;  %p944_p11 = por %p135_p7, %p37_p0 }
  0x11   : > { %p948_p12 = por %p141_p8, %p43_p3  ;;  %s953_s29 = sand.u32 1, %s852_s17  }
  0x12   : > { %s1161_s27 = scalar_select %p944_p11, 1, 0 }
  0x13   : > { %s1162_s28 = scalar_select %p948_p12, 1, 0 }
  0x14   : > { %s631_s30 = sshll.u32 %s856_s18, 8  ;;  %s602_s5 = sshll.u32 %s953_s29, 6 }
  0x15   : > { %s960_s8 = scalar_lea.hbm %s1152_s0, %s631_s30  ;;  %s171_s9 = scalar_lea.vmem [#allocation2], %s602_s5 }
  0x16   : > { %s178_s10 = sshll.u32 %s171_s9, 4  ;;  %p966_p13 = pnand %p659_p10, %p933_p5  ;;  %s970_s10 = int_to_ptr.vmem [resolvable:$true] %s178_s10 }
  0x17   : > { %s168_s12 = scalar_lea.sflag [#allocation3], %s953_s29  ;;  %s726_s13 = scalar_lea.hbm %s960_s8, 1024 }
  0x18   : > { %p727_p1 = scmp.ne.s32.totalorder %s960_s8, %s726_s13  ;;  %p728_p2 = pneg %p966_p13 }
  0x19   : > { %s731_s22 = scalar_lea.hbm %s1152_s0, 2048  ;;  %p732_p5 = scmp.lt.u32.totalorder %s960_s8, %s1152_s0 }
  0x1a   : > { %p729_p3 = pnand %p728_p2, %p727_p1  ;;  %p733_p7 = scmp.lt.u32.totalorder %s731_s22, %s726_s13 }
  0x1b   : > { %p735_p10 = scmp.lt.u32.totalorder %s726_s13, %s960_s8 }
  0x1c   : > { %p730_p4 = pneg %p729_p3  ;;  %p734_p8 = por %p733_p7, %p732_p5 }
  0x1e   : > { %p736_p9 = por %p735_p10, %p734_p8 }
  0x20   : > { %p737_p0 = pnand %p736_p9, %p730_p4 }
  0x22   : > { %740 = shalt.err (!%p737_p0)
}
  0x23   : > { %s741_s30 = scalar_lea.vmem %s970_s10, 1024  ;;  %s858_s6 = smov [#allocation2]  }
  0x24   : > { %p742_p1 = scmp.ne.s32.totalorder %s970_s10, %s741_s30  ;;  %s746_s7 = sshll.u32 %s858_s6, 4  ;;  %s747_s7 = int_to_ptr.vmem [resolvable:$false] %s746_s7 }
  0x25   : > { %s748_s9 = scalar_lea.vmem %s747_s7, 2048  ;;  %p749_p11 = scmp.lt.s32.totalorder %s970_s10, %s747_s7 }
  0x26   : > { %p744_p3 = pnand %p742_p1, %p728_p2  ;;  %p750_p5 = scmp.lt.s32.totalorder %s748_s9, %s741_s30 }
  0x28   : > { %p745_p12 = pneg %p744_p3  ;;  %p751_p7 = por %p750_p5, %p749_p11 }
  0x2a   : > { %p752_p8 = pnand %p751_p7, %p745_p12 }
  0x2c   : > { %755 = shalt.err (!%p752_p8)
}
  0x2d   : > { %s859_s13 = smov 512   ;;  %s860_s14 = smov 256  }
  0x2e   : > { %s861_s20 = smov 16   ;;  %p207_p9 = scmp.lt.s32.totalorder %s856_s18, 3 }
  0x2f   : > { %651 = dma.hbm_to_vmem [thread:$0]  (!%p966_p13), %s960_s8, 1024, %s970_s10, %s168_s12, %s859_s13, %s860_s14, %s861_s20  }
  0x30   : > { %s632_s22 = sshll.u32 %s856_s18, 7  ;;  %p1164_p11 = scmp.ge.s32.totalorder %s856_s18, 1 }
  0x31   : > { %s1013_s6 = scalar_lea.hbm %s1153_s1, %s632_s22  ;;  %s192_s7 = scalar_lea.vmem [#allocation5], %s602_s5 }
  0x32   : > { %p1006_p12 = pnand %p1164_p11, %p207_p9  ;;  %s199_s9 = sshll.u32 %s192_s7, 4  ;;  %s1017_s9 = int_to_ptr.vmem [resolvable:$true] %s199_s9 }
  0x33   : > { %s189_s8 = scalar_lea.sflag [#allocation6], %s953_s29  ;;  %s756_s10 = scalar_lea.hbm %s1013_s6, 1024 }
  0x34   : > { %p757_p0 = scmp.ne.s32.totalorder %s1013_s6, %s756_s10  ;;  %s761_s20 = scalar_lea.hbm %s1153_s1, 2048 }
  0x35   : > { %p762_p1 = scmp.lt.u32.totalorder %s1013_s6, %s1153_s1  ;;  %p763_p3 = scmp.lt.u32.totalorder %s761_s20, %s756_s10 }
  0x36   : > { %p759_p4 = pnand %p757_p0, %p728_p2  ;;  %p765_p7 = scmp.lt.u32.totalorder %s756_s10, %s1013_s6 }
  0x37   : > { %p764_p5 = por %p763_p3, %p762_p1 }
  0x38   : > { %p760_p10 = pneg %p759_p4 }
  0x39   : > { %p766_p8 = por %p765_p7, %p764_p5 }
  0x3b   : > { %p767_p9 = pnand %p766_p8, %p760_p10 }
  0x3d   : > { %770 = shalt.err (!%p767_p9)
}
  0x3e   : > { %s771_s5 = scalar_lea.vmem %s1017_s9, 1024  ;;  %s862_s30 = smov [#allocation5]  }
  0x3f   : > { %p772_p11 = scmp.ne.s32.totalorder %s1017_s9, %s771_s5  ;;  %s776_s7 = sshll.u32 %s862_s30, 4  ;;  %s777_s7 = int_to_ptr.vmem [resolvable:$false] %s776_s7 }
  0x40   : > { %s778_s12 = scalar_lea.vmem %s777_s7, 2048  ;;  %p779_p6 = scmp.lt.s32.totalorder %s1017_s9, %s777_s7 }
  0x41   : > { %p774_p0 = pnand %p772_p11, %p728_p2  ;;  %p780_p1 = scmp.lt.s32.totalorder %s778_s12, %s771_s5 }
  0x43   : > { %p775_p4 = pneg %p774_p0  ;;  %p781_p3 = por %p780_p1, %p779_p6 }
  0x45   : > { %p782_p5 = pnand %p781_p3, %p775_p4 }
  0x47   : > { %785 = shalt.err (!%p782_p5)
}
  0x48   : > { %s863_s10 = smov 128   ;;  %s864_s13 = smov 8  }
  0x49   : > { %654 = dma.hbm_to_vmem [thread:$0]  (!%p966_p13), %s1013_s6, 1024, %s1017_s9, %s189_s8, %s860_s14, %s863_s10, %s864_s13  }
  0x4a   : > { %211 = sbr.rel (%p1006_p12) target bundleno = 390 (0x186), region = 36  ;;  %s1049_s20 = sand.u32 (!%p1006_p12), 1, %s848_s16  }
  0x4b   : > { %s609_s22 = sshll.u32 (!%p1006_p12), %s1049_s20, 6  ;;  %s214_s25 = scalar_lea.sflag (!%p1006_p12), [#allocation3], %s1049_s20 }
  0x4c   : > { %s1053_s5 = scalar_lea.vmem (!%p1006_p12), [#allocation2], %s609_s22  ;;  %p1166_p6 = scmp.ne.s32.totalorder (!%p1006_p12), %s1160_s26, 0 }
  0x51   : > { %831 = dma.done.wait (%p1166_p6), %s214_s25, 1024  }
  0x52   : > { %833 = vsyncadd (%p1166_p6), %s214_s25, 4294966272  ;;  %s223_s29 = scalar_lea.sflag [#allocation6], %s1049_s20  ;;  %s1060_s11 = scalar_lea.vmem [#allocation5], %s609_s22 }
  0x53   : > { %835 = dma.done.wait (%p1166_p6), %s223_s29, 1024  }
  0x54   : > { %837 = vsyncadd (%p1166_p6), %s223_s29, 4294966272  ;;  %v865_v0 = vmov 0   ;;  %v704_v1 = vld [vmem:[%s1060_s11 + $0x4] ss:$8 sps:$4 sm:$0xff]   ;;  %v706_v2 = vld [vmem:[%s1060_s11] ss:$8 sps:$4 sm:$0xff]  }
  0x55   : > { %369 = vmatprep.mubr.bf16.mxu0 %v865_v0  ;;  %379 = vmatprep.mubr.bf16.mxu1 %v865_v0  ;;  %v707_v3 = vld [vmem:[%s1060_s11 + $0x14] ss:$8 sps:$4 sm:$0xff]   ;;  %v709_v4 = vld [vmem:[%s1060_s11 + $0x10] ss:$8 sps:$4 sm:$0xff]   ;;  %v710_v5 = vld [vmem:[%s1060_s11 + $0x24] ss:$8 sps:$4 sm:$0xff]  }
  0x56   : > { %701 = vset.pattern.permute.xlu0 %v865_v0  ;;  %702 = vset.pattern.permute.xlu1 %v865_v0  ;;  %v712_v6 = vld [vmem:[%s1060_s11 + $0x20] ss:$8 sps:$4 sm:$0xff]   ;;  %v400_v8 = vld [vmem:[%s1155_s3 + $0x10] sm:$0xff]  ;;  %v401_v11 = vld [vmem:[%s1155_s3 + $0x18] sm:$0xff]  ;;  %vm330_vm0 = vcmask 523264   ;;  %v866_v16 = vmov 1  }
  0x57   : > { %337 = vmatprep.subr.bf16.mxu0 %v704_v1  ;;  %634 = vmatprep.subr.bf16.mxu1 %v704_v1  ;;  %v398_v7 = vld [vmem:[%s1155_s3] sm:$0xff]  ;;  %v713_v9 = vld [vmem:[%s1060_s11 + $0x34] ss:$8 sps:$4 sm:$0xff]   ;;  %v399_v10 = vld [vmem:[%s1155_s3 + $0x8] sm:$0xff]  ;;  %s492_s8 = scalar_lea.sflag [#allocation4], %s1049_s20  ;;  %p1167_p2 = scmp.ne.s32.totalorder %s1161_s27, 0 }
  0x58   : > { %338 = vmatpush1.bf16.msra.mxu0 %v706_v2  ;;  %638 = vmatpush1.bf16.msra.mxu1 %v706_v2  ;;  %v715_v12 = vld [vmem:[%s1060_s11 + $0x30] ss:$8 sps:$4 sm:$0xff]   ;;  %v716_v13 = vld [vmem:[%s1154_s2] sm:$0xff]   ;;  %v717_v14 = vld [vmem:[%s1154_s2 + $0x8] sm:$0xff]   ;;  %s633_s11 = sshll.u32 %s915_s19, 5  ;;  %s868_s19 = smov [#allocation7]  }
  0x59   : > { %339 = vmatprep.subr.bf16.mxu0 %v707_v3  ;;  %635 = vmatprep.subr.bf16.mxu1 %v707_v3  ;;  %v402_v15 = vld [vmem:[%s1155_s3] sm:$0x1]  ;;  %v273_v20 = vld [vmem:[%s1053_s5 + $0x8] sm:$0xff]  ;;  %v274_v25 = vld [vmem:[%s1053_s5 + $0x10] sm:$0xff]  ;;  %s1108_s9 = scalar_lea.hbm %s1156_s4, %s633_s11  ;;  %s790_s7 = sshll.u32 %s868_s19, 4  ;;  %s791_s7 = int_to_ptr.vmem [resolvable:$false] %s790_s7 }
  0x5a   : > { %405 = vperm.xlu0 %701, %v398_v7   ;;  %415 = vperm.xlu1 %702, %v400_v8   ;;  %v272_v17 = vld [vmem:[%s1053_s5] sm:$0xff]  ;;  %v277_v21 = vld [vmem:[%s1053_s5 + $0x28] sm:$0xff]  ;;  %v278_v26 = vld [vmem:[%s1053_s5 + $0x30] sm:$0xff]  ;;  %s792_s12 = scalar_lea.vmem %s791_s7, 64 }
  0x5b   : > { %v276_v18 = vld [vmem:[%s1053_s5 + $0x20] sm:$0xff]  ;;  %v275_v31 = vld [vmem:[%s1053_s5 + $0x18] sm:$0xff] }
  0x5c   : > { %340 = vmatpush1.bf16.msra.mxu0 %v709_v4  ;;  %639 = vmatpush1.bf16.msra.mxu1 %v709_v4  ;;  %v279_v32 = vld [vmem:[%s1053_s5 + $0x38] sm:$0xff]  ;;  %s611_s5 = sshll.u32 %s1049_s20, 1 }
  0x5d   : > { %341 = vmatprep.subr.bf16.mxu0 %v710_v5  ;;  %636 = vmatprep.subr.bf16.mxu1 %v710_v5  ;;  %s255_s26 = scalar_lea.vmem [#allocation7], %s611_s5 }
  0x5e   : > { %410 = vperm.xlu0 %701, %v399_v10   ;;  %420 = vperm.xlu1 %702, %v401_v11   ;;  %s506_s14 = sshll.u32 %s255_s26, 4  ;;  %s1110_s14 = int_to_ptr.vmem [resolvable:$true] %s506_s14 }
  0x5f   : > { %s786_s30 = scalar_lea.vmem %s1110_s14, 32  ;;  %p793_p7 = scmp.lt.s32.totalorder %s1110_s14, %s791_s7 }
  0x60   : > { %342 = vmatpush1.bf16.msra.mxu0 %v712_v6  ;;  %640 = vmatpush1.bf16.msra.mxu1 %v712_v6  ;;  %p787_p13 = scmp.ne.s32.totalorder %s1110_s14, %s786_s30  ;;  %p794_p8 = scmp.lt.s32.totalorder %s792_s12, %s786_s30 }
  0x61   : > { %343 = vmatprep.subr.bf16.mxu0 %v713_v9  ;;  %637 = vmatprep.subr.bf16.mxu1 %v713_v9 }
  0x62   : > { %703 = vset.pattern.permute.xlu0 %v866_v16  ;;  %p788_p12 = pnand %p787_p13, %p1167_p2  ;;  %p795_p9 = por %p794_p8, %p793_p7 }
  0x63   : > { %451 = vperm.xlu0 %703, %v402_v15  }
  0x64   : > { %344 = vmatpush1.bf16.msra.mxu0 %v715_v12  ;;  %641 = vmatpush1.bf16.msra.mxu1 %v715_v12  ;;  %p789_p10 = pneg %p788_p12 }
  0x66   : > { %p796_p11 = pnand %p795_p9, %p789_p10 }
  0x67   : > { %622 = vmatmul.mubr.msk.bf16.vlgmr.msra.gmra.mrb[0].mxu0 %vm330_vm0, %v716_v13  ;;  %623 = vmatmul.mubr.msk.bf16.vlgmr.msra.gmra.mrb[0].mxu1 %vm330_vm0, %v717_v14 }
  0xd9   : > { %v406_v19 = vpop.permute.xlu0 %405  ;;  %v416_v22 = vpop.permute.xlu1 %415 }
  0xdd   : > { %v411_v48 = vpop.permute.xlu0 %410  ;;  %v421_v57 = vpop.permute.xlu1 %420 }
  0xe2   : > { %v452_v12 = vpop.permute.xlu0 %451 }
 0x13a   : > { %v371_v23 = vpop.f32.mrb[0].mxu0  ;;  %v381_v24 = vpop.f32.mrb[0].mxu1 }
 0x13b   : > { %v372_v27 = vadd.f32 %v371_v23, %v272_v17  ;;  %v382_v28 = vadd.f32 %v381_v24, %v276_v18  ;;  %v373_v29 = vpop.f32.mrb[1].mxu0  ;;  %v383_v30 = vpop.f32.mrb[1].mxu1  ;;  %v867_v24 = vmov 1966171168  }
 0x13c   : > { %v374_v33 = vadd.f32 %v373_v29, %v273_v20  ;;  %v384_v34 = vadd.f32 %v383_v30, %v277_v21  ;;  %v375_v35 = vpop.f32.mrb[2].mxu0  ;;  %v385_v36 = vpop.f32.mrb[2].mxu1 }
 0x13d   : > { %v390_v37 = vmax.f32 %v372_v27, 0.0  ;;  %v394_v38 = vmax.f32 %v382_v28, 0.0  ;;  %v376_v39 = vadd.f32 %v375_v35, %v274_v25  ;;  %v386_v40 = vadd.f32 %v385_v36, %v278_v26  ;;  %v377_v41 = vpop.f32.mrb[3].mxu0  ;;  %v387_v42 = vpop.f32.mrb[3].mxu1 }
 0x13e   : > { %v391_v43 = vmax.f32 %v374_v33, 0.0  ;;  %v378_v44 = vadd.f32 %v377_v41, %v275_v31  ;;  %v388_v45 = vadd.f32 %v387_v42, %v279_v32  ;;  %v395_v47 = vmax.f32 %v384_v34, 0.0 }
 0x13f   : > { %v392_v46 = vmax.f32 %v376_v39, 0.0  ;;  %v423_v50 = vmul.f32 %v406_v19, %v390_v37  ;;  %v396_v51 = vmax.f32 %v386_v40, 0.0  ;;  %v427_v52 = vmul.f32 %v416_v22, %v394_v38 }
 0x140   : > { %v393_v49 = vmax.f32 %v378_v44, 0.0  ;;  %v424_v54 = vmul.f32 %v406_v19, %v391_v43  ;;  %v397_v56 = vmax.f32 %v388_v45, 0.0  ;;  %v428_v59 = vmul.f32 %v416_v22, %v395_v47 }
 0x141   : > { %v425_v53 = vmul.f32 %v411_v48, %v392_v46  ;;  %v429_v61 = vmul.f32 %v421_v57, %v396_v51  ;;  %v472_v25 = vunpack.c.l.s4 %v867_v24  ;;  %v474_v26 = vlaneseq }
 0x142   : > { %v426_v55 = vmul.f32 %v411_v48, %v393_v49  ;;  %v430_v63 = vmul.f32 %v421_v57, %v397_v56 }
 0x143   : > { %v431_v58 = vadd.f32 %v425_v53, %v423_v50  ;;  %v473_v27 = vunpack.c.0.s8 %v472_v25  ;;  %v475_v28 = vshrl.u32 %v474_v26, 7  ;;  %vm488_vm1 = vcmp.lt.s32.totalorder %v474_v26, 256 }
 0x144   : > { %v440_v60 = vadd.f32 %v426_v55, %v424_v54 }
 0x145   : > { %v432_v62 = vadd.f32 %v431_v58, %v427_v52  ;;  %v476_v30 = vsub.s32 %v473_v27, %v475_v28 }
 0x146   : > { %v441_v0 = vadd.f32 %v440_v60, %v428_v59 }
 0x147   : > { %v433_v1 = vadd.f32 %v432_v62, %v429_v61 }
 0x148   : > { %v442_v2 = vadd.f32 %v441_v0, %v430_v63 }
 0x149   : > { %v434_v3 = vrot.slane %v433_v1, 4 }
 0x14a   : > { %v443_v4 = vrot.slane %v442_v2, 4 }
 0x14b   : > { %v435_v5 = vadd.f32 %v434_v3, %v433_v1 }
 0x14c   : > { %v444_v6 = vadd.f32 %v443_v4, %v442_v2 }
 0x14d   : > { %v436_v7 = vrot.slane %v435_v5, 2 }
 0x14e   : > { %v445_v8 = vrot.slane %v444_v6, 2 }
 0x14f   : > { %v437_v9 = vadd.f32 %v436_v7, %v435_v5 }
 0x150   : > { %v446_v10 = vadd.f32 %v445_v8, %v444_v6 }
 0x151   : > { %v438_v11 = vrot.slane %v437_v9, 1 }
 0x152   : > { %v447_v13 = vrot.slane %v446_v10, 1 }
 0x153   : > { %v439_v14 = vadd.f32 %v438_v11, %v437_v9 }
 0x154   : > { %v448_v15 = vadd.f32 %v447_v13, %v446_v10 }
 0x155   : > { %v454_v16 = vadd.f32 %v452_v12, %v439_v14 }
 0x156   : > { %v455_v17 = vadd.f32 %v452_v12, %v448_v15 }
 0x157   : > { %v624_v18 = vmul.f32 -1.442695, %v454_v16 }
 0x158   : > { %v625_v19 = vmul.f32 -1.442695, %v455_v17 }
 0x159   : > { %718 = vpow2.f32 %v624_v18 }
 0x15a   : > { %720 = vpow2.f32 %v625_v19 }
 0x163   : > { %v719_v20 = vpop.eup %718 }
 0x164   : > { %v721_v21 = vpop.eup %720  ;;  %v462_v22 = vadd.f32 1.0, %v719_v20 }
 0x165   : > { %v463_v23 = vadd.f32 1.0, %v721_v21 }
 0x166   : > { %722 = vrcp.f32 %v462_v22 }
 0x167   : > { %724 = vrcp.f32 %v463_v23 }
 0x170   : > { %v723_v29 = vpop.eup %722 }
 0x171   : > { %v725_v31 = vpop.eup %724 }
 0x172   : > { %v470_v32 = vcombine.low %v723_v29, %v725_v31 }
 0x174   : > { %v477_v33 = vrot.slane %v470_v32, %v476_v30 }
 0x176   : > { %v484_v34 = vrot.slane %v477_v33, %v476_v30 }
 0x178   : > { %490 = vst.msk [vmem:[%s255_s26] sm:$0x3] %vm488_vm1, %v484_v34 }
 0x179   : > { %799 = shalt.err (!%p796_p11)
}
 0x17a   : > { %s800_s20 = scalar_lea.hbm %s1108_s9, 32  ;;  %s804_s22 = scalar_lea.hbm %s1156_s4, 64 }
 0x17b   : > { %p801_p0 = scmp.ne.s32.totalorder %s1108_s9, %s800_s20  ;;  %p805_p3 = scmp.lt.u32.totalorder %s1108_s9, %s1156_s4 }
 0x17c   : > { %p806_p5 = scmp.lt.u32.totalorder %s804_s22, %s800_s20  ;;  %p808_p13 = scmp.lt.u32.totalorder %s800_s20, %s1108_s9 }
 0x17d   : > { %p802_p4 = pnand %p801_p0, %p1167_p2 }
 0x17e   : > { %p807_p6 = por %p806_p5, %p805_p3 }
 0x17f   : > { %p803_p1 = pneg %p802_p4 }
 0x180   : > { %p809_p12 = por %p808_p13, %p807_p6 }
 0x182   : > { %p810_p10 = pnand %p809_p12, %p803_p1 }
 0x184   : > { %813 = shalt.err (!%p810_p10)
}
 0x185   : > { %646 = dma.vmem_to_hbm [thread:$0]  (%p1167_p2), %s1110_s14, 32, %s1108_s9, %s492_s8  }
 0x186 PF: > { %s518_s5 = sand.u32 1, %s844_s15   ;;  %p1168_p7 = scmp.ne.s32.totalorder %s1162_s28, 0 }
 0x187   : > { %p1169_p8 = scmp.ge.s32.totalorder %s856_s18, 2  ;;  %s519_s11 = scalar_lea.sflag [#allocation4], %s518_s5 }
 0x189   : > { %p656_p9 = pnand %p1169_p8, %p1168_p7 }
 0x18b   : > { %839 = dma.done.wait (!%p656_p9), %s519_s11, 32  }
 0x18c   : > { %841 = vsyncadd (!%p656_p9), %s519_s11, 4294967264  ;;  %p20_p11 = scmp.ge.s32.totalorder %s919_s21, 4   ;;  %s1170_s15 = smov %s848_s16 }
 0x18d   : > { %s1171_s16 = smov %s852_s17  ;;  %s1172_s17 = smov %s931_s24 }
 0x18e   : > { %s1173_s18 = smov %s919_s21  ;;  %22 = sbr.rel (!%p20_p11) target bundleno = 7 (0x7), region = 94 }
 0x195   :  { %524 = vsyncpa [#allocation3], 1 }
 0x196   :  { %526 = vsyncpa [#allocation3 + $0x1], 1 }
 0x197   :  { %527 = vsyncpa [#allocation6], 1 }
 0x198   :  { %529 = vsyncpa [#allocation6 + $0x1], 1 }
 0x199   :  { %530 = vsyncpa [#allocation4], 1 }
 0x19a   :  { %532 = vsyncpa [#allocation4 + $0x1], 1 }

</bundles_post_ra>
